<compile_context>
chip_gen: v7x
topology: tpu7x:2x2x1
jax: 0.10.0
libtpu: 0.0.40
codegen_flags: <defaults>
</compile_context>

<pallas_src>
import jax
import jax.numpy as jnp
import numpy as np
from jax.experimental import pallas as pl
from jax.experimental.pallas import tpu as pltpu

# ---- small, deterministic problem sizes (grayscale tracker-style input) ----
B, CIN, H, W = 2, 1, 16, 16
COUT = 8                       # backbone feature channels
KH = KW = 3                    # conv kernel
LANES = W * COUT               # conv-output lane layout: lane = j*COUT + c  (= 128, lane-dense)
assert LANES == 128

# packed parameter slab layout (rows x 128 lanes, all section starts 8-aligned)
BAND_K = KH * (W + 2)          # 54  : true contraction length of the fused banded conv matmul
BAND_ROWS = 56                 # 54 padded to a multiple of 8 sublanes (review item 8)
BIAS_COL = BAND_K              # 54  : ones column in xwin -> conv bias folded into band row 54
G_OFF = BAND_ROWS              # 56  : fused (GAP-over-j @ all three heads) matrix, 128 rows
POOL_ROW = G_OFF + LANES       # 184 : precomputed (B, B*H) GAP-over-rows selection matrix
BH_ROW = POOL_ROW + B          # 186 : fused head-bias row (lanes 0:3 | 3:7 | 7:11)
QMASK_ROW = BH_ROW + 1         # 187 : quaternion-lane mask (1.0 on lanes [3,7))
SLAB_ROWS = 192
EPS = 1e-12                    # quaternion-normalization epsilon (matches F.normalize default)


def _opentrack_kernel(xw_ref, slab_ref, out_ref):
    # --- 3x3 conv (stride 1, pad 1) + bias + ReLU as ONE banded MXU matmul -----------------
    # h[(b,i), j*COUT+c] = sum_{kh,kw} xp[b,i+kh,j+kw]*w[kh,kw,c] + bconv[c]
    # (bias comes from the ones column of xw against band row 54)
    h = jnp.maximum(
        jnp.dot(xw_ref[...], slab_ref[0:BAND_ROWS, :],
                preferred_element_type=jnp.float32),
        0.0)                                                          # (B*H, 128)

    # --- global average pool + all three heads, fused on the MXU ---------------------------
    # pool over image rows i with the precomputed selection matrix (no runtime iota build);
    # pool over j, 1/(H*W) and coord/quat/box weights are pre-folded into G.
    pool = slab_ref[POOL_ROW:POOL_ROW + B, 0:B * H]                   # (B, B*H)
    ysum = jnp.dot(pool, h, preferred_element_type=jnp.float32)       # (B, 128)
    y = jnp.dot(ysum, slab_ref[G_OFF:G_OFF + LANES, :],
                preferred_element_type=jnp.float32)
    y = y + slab_ref[BH_ROW:BH_ROW + 1, :]                            # fused head biases

    # --- L2-normalize the quaternion lanes [3, 7) with the precomputed lane mask -----------
    qmask = slab_ref[QMASK_ROW:QMASK_ROW + 1, :]                      # (1, 128)
    qsq = y * y * qmask
    inv = jax.lax.rsqrt(jnp.sum(qsq, axis=-1, keepdims=True) + EPS)
    out_ref[...] = y + y * qmask * (inv - 1.0)                        # single lane-dense store


def init_params(key):
    ks = jax.random.split(key, 8)
    s = 0.1
    return {
        "wconv":  s * jax.random.normal(ks[0], (KH, KW, COUT), jnp.float32),
        "bconv":  s * jax.random.normal(ks[1], (COUT,), jnp.float32),
        "wcoord": s * jax.random.normal(ks[2], (COUT, 3), jnp.float32),
        "bcoord": s * jax.random.normal(ks[3], (3,), jnp.float32),
        "wquat":  s * jax.random.normal(ks[4], (COUT, 4), jnp.float32),
        "bquat":  s * jax.random.normal(ks[5], (4,), jnp.float32),
        "wbox":   s * jax.random.normal(ks[6], (COUT, 4), jnp.float32),
        "bbox":   s * jax.random.normal(ks[7], (4,), jnp.float32),
    }


def pack_params(p):
    """One-time (export-style) repacking of all weights/biases into a single (192,128) slab."""
    w = np.asarray(p["wconv"], np.float32)                            # (KH, KW, COUT)
    slab = np.zeros((SLAB_ROWS, LANES), np.float32)
    # fused band block (one MXU pass): BAND[kh*(W+2) + j + kw, j*COUT + c] = w[kh, kw, c]
    for kh in range(KH):
        for kw in range(KW):
            for j in range(W):
                slab[kh * (W + 2) + j + kw, j * COUT:(j + 1) * COUT] = w[kh, kw, :]
    # conv bias folded into the band block via the ones column (xwin[:, BIAS_COL] == 1)
    slab[BIAS_COL, :] = np.tile(np.asarray(p["bconv"], np.float32), W)
    # fused (GAP-over-j @ all three heads): G = Q0 @ W_heads, Q0 carries the 1/(H*W) factor
    whp = np.zeros((COUT, LANES), np.float32)
    whp[:, 0:3] = np.asarray(p["wcoord"], np.float32)
    whp[:, 3:7] = np.asarray(p["wquat"], np.float32)
    whp[:, 7:11] = np.asarray(p["wbox"], np.float32)
    q0 = np.zeros((LANES, COUT), np.float32)
    for c in range(COUT):
        q0[c::COUT, c] = 1.0 / (H * W)
    slab[G_OFF:G_OFF + LANES, :] = q0 @ whp
    # precomputed GAP-over-rows selection matrix (review: no runtime iota build)
    for b in range(B):
        slab[POOL_ROW + b, b * H:(b + 1) * H] = 1.0
    # fused head-bias row and quaternion-lane mask
    slab[BH_ROW, 0:3] = np.asarray(p["bcoord"], np.float32)
    slab[BH_ROW, 3:7] = np.asarray(p["bquat"], np.float32)
    slab[BH_ROW, 7:11] = np.asarray(p["bbox"], np.float32)
    slab[QMASK_ROW, 3:7] = 1.0
    return jnp.asarray(slab)


def _build_xwin(x_nchw):
    """Shifted-window image for the fused banded conv matmul (fuses with the pad in one XLA
    fusion): column kh*(W+2)+t = xp[b, i+kh, t]; column 54 = 1 (conv bias); column 55 = 0."""
    x = x_nchw.astype(jnp.float32).reshape(B, H, W)
    xp = jnp.pad(x, ((0, 0), (1, 1), (1, 1)))                         # (B, H+2, W+2)
    xwin = jnp.concatenate([xp[:, kh:kh + H, :] for kh in range(KH)], axis=-1)
    xwin = xwin.reshape(B * H, BAND_K)                                 # (B*H, 54)
    tail = jnp.concatenate(
        [jnp.ones((B * H, 1), jnp.float32),
         jnp.zeros((B * H, BAND_ROWS - BAND_K - 1), jnp.float32)], axis=-1)
    return jnp.concatenate([xwin, tail], axis=-1)                      # (B*H, 56)


@jax.jit
def model_for_opentrack_packed(x_nchw, slab):
    """Hot path: returns the packed lane-dense (B, 128) result (cols 0:3 | 3:7 | 7:11)."""
    xwin = _build_xwin(x_nchw)
    vspec = pl.BlockSpec(memory_space=pltpu.MemorySpace.VMEM)
    return pl.pallas_call(
        _opentrack_kernel,
        out_shape=jax.ShapeDtypeStruct((B, LANES), jnp.float32),
        in_specs=[vspec, vspec],
        out_specs=vspec,
    )(xwin, slab)


def model_for_opentrack(x_nchw, slab):
    """ModelForOpenTrack output contract ('coord'->pos_size, 'pose'->quat, 'roi'->box).
    Slicing stays outside the jitted hot path (review: keep the jit output packed)."""
    packed = model_for_opentrack_packed(x_nchw, slab)
    return packed[:, 0:3], packed[:, 3:7], packed[:, 7:11]


def reference_forward(x_nchw, p):
    """Float64 numpy reference with identical semantics (conv3x3+ReLU -> GAP -> 3 heads)."""
    x = np.asarray(x_nchw, np.float64).reshape(B, H, W)
    xp = np.pad(x, ((0, 0), (1, 1), (1, 1)))
    w = np.asarray(p["wconv"], np.float64)
    h = np.zeros((B, H, W, COUT), np.float64)
    for kh in range(KH):
        for kw in range(KW):
            h += xp[:, kh:kh + H, kw:kw + W, None] * w[kh, kw][None, None, None, :]
    h = np.maximum(h + np.asarray(p["bconv"], np.float64), 0.0)
    feat = h.reshape(B, H * W, COUT).mean(axis=1)
    coord = feat @ np.asarray(p["wcoord"], np.float64) + np.asarray(p["bcoord"], np.float64)
    q = feat @ np.asarray(p["wquat"], np.float64) + np.asarray(p["bquat"], np.float64)
    quat = q / np.sqrt((q * q).sum(-1, keepdims=True) + EPS)
    box = feat @ np.asarray(p["wbox"], np.float64) + np.asarray(p["bbox"], np.float64)
    return coord, quat, box


if __name__ == "__main__":
    key = jax.random.PRNGKey(0)
    kx, kp = jax.random.split(key)
    x = jax.random.normal(kx, (B, CIN, H, W), jnp.float32)   # NCHW, like torch
    params = init_params(kp)
    slab = pack_params(params)

    packed = model_for_opentrack_packed(x, slab)
    jax.block_until_ready(packed)
    assert packed.shape == (B, LANES)

    coord = np.asarray(packed[:, 0:3])
    quat = np.asarray(packed[:, 3:7])
    box = np.asarray(packed[:, 7:11])
    assert coord.shape == (B, 3) and quat.shape == (B, 4) and box.shape == (B, 4)

    rc, rq, rb = reference_forward(x, params)
    # Tolerance tightened from 5e-2 to 1e-5 per review (all-f32 pipeline, catches packing bugs).
    np.testing.assert_allclose(coord, rc, rtol=1e-5, atol=1e-5)
    np.testing.assert_allclose(quat, rq, rtol=1e-5, atol=1e-5)
    np.testing.assert_allclose(box, rb, rtol=1e-5, atol=1e-5)
    print("KERNEL_OK")
</pallas_src>

<mosaic_0001>
module attributes {stable_mosaic.version = 11 : i64} {
  func.func @_opentrack_kernel(%arg0: memref<32x56xf32, #tpu.memory_space<vmem>>, %arg1: memref<192x128xf32, #tpu.memory_space<vmem>>, %arg2: memref<2x128xf32, #tpu.memory_space<vmem>>) attributes {dimension_semantics = [], scalar_prefetch = 0 : i64, scratch_operands = 0 : i64, tpu.core_type = #tpu.core_type<tc>} {
    %c0 = arith.constant 0 : index
    %c0_0 = arith.constant 0 : index
    %0 = vector.load %arg0[%c0, %c0_0] : memref<32x56xf32, #tpu.memory_space<vmem>>, vector<32x56xf32>
    %c0_1 = arith.constant 0 : index
    %c0_2 = arith.constant 0 : index
    %1 = vector.load %arg1[%c0_1, %c0_2] : memref<192x128xf32, #tpu.memory_space<vmem>>, vector<56x128xf32>
    %cst = arith.constant dense<0.000000e+00> : vector<32x128xf32>
    %2 = tpu.matmul %0, %1, %cst {dimension_numbers = #tpu.dot_dimension_numbers<[1], [0], [0], [1], [0, 0, 1, 1], [], []>} : vector<32x56xf32>, vector<56x128xf32>, vector<32x128xf32> -> vector<32x128xf32>
    %cst_3 = arith.constant 0.000000e+00 : f32
    %3 = vector.broadcast %cst_3 : f32 to vector<32x128xf32>
    %4 = arith.maximumf %2, %3 : vector<32x128xf32>
    %c184 = arith.constant 184 : index
    %c0_4 = arith.constant 0 : index
    %5 = vector.load %arg1[%c184, %c0_4] : memref<192x128xf32, #tpu.memory_space<vmem>>, vector<2x32xf32>
    %cst_5 = arith.constant dense<0.000000e+00> : vector<2x128xf32>
    %6 = tpu.matmul %5, %4, %cst_5 {dimension_numbers = #tpu.dot_dimension_numbers<[1], [0], [0], [1], [0, 0, 1, 1], [], []>} : vector<2x32xf32>, vector<32x128xf32>, vector<2x128xf32> -> vector<2x128xf32>
    %c56 = arith.constant 56 : index
    %c0_6 = arith.constant 0 : index
    %7 = vector.load %arg1[%c56, %c0_6] : memref<192x128xf32, #tpu.memory_space<vmem>>, vector<128x128xf32>
    %cst_7 = arith.constant dense<0.000000e+00> : vector<2x128xf32>
    %8 = tpu.matmul %6, %7, %cst_7 {dimension_numbers = #tpu.dot_dimension_numbers<[1], [0], [0], [1], [0, 0, 1, 1], [], []>} : vector<2x128xf32>, vector<128x128xf32>, vector<2x128xf32> -> vector<2x128xf32>
    %c186 = arith.constant 186 : index
    %c0_8 = arith.constant 0 : index
    %9 = vector.load %arg1[%c186, %c0_8] : memref<192x128xf32, #tpu.memory_space<vmem>>, vector<1x128xf32>
    %10 = vector.broadcast %9 : vector<1x128xf32> to vector<2x128xf32>
    %11 = arith.addf %8, %10 : vector<2x128xf32>
    %c187 = arith.constant 187 : index
    %c0_9 = arith.constant 0 : index
    %12 = vector.load %arg1[%c187, %c0_9] : memref<192x128xf32, #tpu.memory_space<vmem>>, vector<1x128xf32>
    %13 = arith.mulf %11, %11 : vector<2x128xf32>
    %14 = vector.broadcast %12 : vector<1x128xf32> to vector<2x128xf32>
    %15 = arith.mulf %13, %14 : vector<2x128xf32>
    %cst_10 = arith.constant dense<0.000000e+00> : vector<2xf32>
    %16 = vector.multi_reduction <add>, %15, %cst_10 [1] : vector<2x128xf32> to vector<2xf32>
    %17 = vector.shape_cast %16 : vector<2xf32> to vector<2x1xf32>
    %cst_11 = arith.constant 9.99999996E-13 : f32
    %18 = vector.broadcast %cst_11 : f32 to vector<2x1xf32>
    %19 = arith.addf %17, %18 : vector<2x1xf32>
    %20 = math.rsqrt %19 : vector<2x1xf32>
    %21 = vector.broadcast %12 : vector<1x128xf32> to vector<2x128xf32>
    %22 = arith.mulf %11, %21 : vector<2x128xf32>
    %cst_12 = arith.constant 1.000000e+00 : f32
    %23 = vector.broadcast %cst_12 : f32 to vector<2x1xf32>
    %24 = arith.subf %20, %23 : vector<2x1xf32>
    %25 = vector.broadcast %24 : vector<2x1xf32> to vector<2x128xf32>
    %26 = arith.mulf %22, %25 : vector<2x128xf32>
    %27 = arith.addf %11, %26 : vector<2x128xf32>
    %c0_13 = arith.constant 0 : index
    %c0_14 = arith.constant 0 : index
    %28 = vector.load %arg2[%c0_13, %c0_14] : memref<2x128xf32, #tpu.memory_space<vmem>>, vector<2x128xf32>
    tpu.vector_store %arg2[%c0_13, %c0_14], %27 {strides = array<i32>} : memref<2x128xf32, #tpu.memory_space<vmem>>, vector<2x128xf32>,
    return
  }
}

</mosaic_0001>

<bundles_post_ra>
// kernel: model_for_opentrack_packed.1
= control target key start
LH: loop header
LB: loop body
LE: loop exit
PB: predicated region body
PF: predicated region fallthrough
CT: control target
= control target key end

     0   :  { %vm23_vm0 = vcmask 457728   ;;  %s627_s0 = inlined_call_operand.vmem [shape: f32[32,56], index: 0, kind: input, shape index: {}]   ;;  %s628_s1 = inlined_call_operand.vmem [shape: f32[192,128], index: 1, kind: input, shape index: {}]   ;;  %s629_s2 = inlined_call_operand.hbm [shape: f32[2,128], index: 2, kind: output, shape index: {}]  }
   0x1   :  { %v16_v0 = vld [vmem:[%s628_s1] sm:$0xff]  ;;  %v17_v1 = vld [vmem:[%s628_s1 + $0x8] sm:$0xff]  ;;  %v18_v2 = vld [vmem:[%s628_s1 + $0x10] sm:$0xff] }
   0x2   :  { %v430_v3 = vpack.c.bf16 %v17_v1, %v16_v0  ;;  %v19_v4 = vld [vmem:[%s628_s1 + $0x18] sm:$0xff]  ;;  %v20_v6 = vld [vmem:[%s628_s1 + $0x20] sm:$0xff]  ;;  %v21_v7 = vld [vmem:[%s628_s1 + $0x28] sm:$0xff] }
   0x3   :  { %v434_v5 = vpack.c.bf16 %v19_v4, %v18_v2  ;;  %v12_v8 = vld [vmem:[%s627_s0] sm:$0xff] }
   0x4   :  { %431 = vmatprep.subr.bf16.mxu0 %v430_v3  ;;  %378 = vmatprep.mubr.msk.f32.mxu0 %vm23_vm0, %v12_v8 }
   0x5   :  { %7 = vsyncpa [#allocation3], 0  ;;  %433 = vmatpush3.bf16.msra.mxu0 %v430_v3  ;;  %v438_v9 = vpack.c.bf16 %v21_v7, %v20_v6  ;;  %v22_v10 = vld [vmem:[%s628_s1 + $0x30] sm:$0xff]  ;;  %v13_v11 = vld [vmem:[%s627_s0 + $0x8] sm:$0xff]  ;;  %v502_v14 = vmov 0.0|0.0   ;;  %vm503_vm1 = vmmov 0  }
   0x6   :  { %435 = vmatprep.subr.bf16.mxu0 %v434_v5  ;;  %v14_v12 = vld [vmem:[%s627_s0 + $0x10] sm:$0xff]  ;;  %v15_v13 = vld [vmem:[%s627_s0 + $0x18] sm:$0xff]  ;;  %448 = vmatprep.subr.bf16.mxu1 %v502_v14  ;;  %v504_v15 = vmov 0.0   ;;  %v201_v17 = vld [vmem:[%s628_s1 + $0x40] sm:$0xff]  ;;  %vm126_vm2 = vcmask 261120   ;;  %vm298_vm3 = vcmask 1041408  }
   0x7   :  { %427 = vmatprep.mubr.msk.f32.mxu1 %vm503_vm1, %v504_v15  ;;  %v200_v16 = vld [vmem:[%s628_s1 + $0x38] sm:$0xff]  ;;  %v202_v18 = vld [vmem:[%s628_s1 + $0x48] sm:$0xff]  ;;  %v203_v20 = vld [vmem:[%s628_s1 + $0x50] sm:$0xff]  ;;  %s505_s11 = smov [#allocation2]  }
   0x8   :  { %v449_v19 = vpack.c.bf16 %v201_v17, %v200_v16  ;;  %v452_v21 = vpack.c.bf16 %v203_v20, %v202_v18  ;;  %v204_v22 = vld [vmem:[%s628_s1 + $0x58] sm:$0xff]  ;;  %v205_v23 = vld [vmem:[%s628_s1 + $0x60] sm:$0xff]  ;;  %v206_v25 = vld [vmem:[%s628_s1 + $0x68] sm:$0xff]  ;;  %s315_s12 = sshll.u32 %s505_s11, 4  ;;  %s316_s12 = int_to_ptr.vmem [resolvable:$true] %s315_s12 }
   0x9   :  { %437 = vmatpush3.bf16.msra.mxu0 %v434_v5  ;;  %v455_v24 = vpack.c.bf16 %v205_v23, %v204_v22  ;;  %v207_v26 = vld [vmem:[%s628_s1 + $0x70] sm:$0xff]  ;;  %v208_v28 = vld [vmem:[%s628_s1 + $0x78] sm:$0xff]  ;;  %v209_v29 = vld [vmem:[%s628_s1 + $0x80] sm:$0xff]  ;;  %s478_s13 = scalar_lea.vmem %s316_s12, 32  ;;  %p483_p1 = scmp.lt.s32.totalorder %s316_s12, %s316_s12 }
   0xa   :  { %439 = vmatprep.subr.bf16.mxu0 %v438_v9  ;;  %450 = vmatpush3.bf16.msra.mxu1 %v449_v19  ;;  %v458_v27 = vpack.c.bf16 %v207_v26, %v206_v25  ;;  %v461_v30 = vpack.c.bf16 %v209_v29, %v208_v28  ;;  %v210_v31 = vld [vmem:[%s628_s1 + $0x88] sm:$0xff]  ;;  %v211_v32 = vld [vmem:[%s628_s1 + $0x90] sm:$0xff]  ;;  %v212_v34 = vld [vmem:[%s628_s1 + $0x98] sm:$0xff]  ;;  %p479_p0 = scmp.ne.s32.totalorder %s316_s12, %s478_s13  ;;  %p484_p2 = scmp.lt.s32.totalorder %s478_s13, %s478_s13 }
   0xb   :  { %451 = vmatprep.subr.bf16.mxu1 %v502_v14  ;;  %v464_v33 = vpack.c.bf16 %v211_v32, %v210_v31  ;;  %v213_v35 = vld [vmem:[%s628_s1 + $0xa0] sm:$0xff]  ;;  %v214_v37 = vld [vmem:[%s628_s1 + $0xa8] sm:$0xff]  ;;  %v215_v38 = vld [vmem:[%s628_s1 + $0xb0] sm:$0xff] }
   0xc   :  { %v467_v36 = vpack.c.bf16 %v213_v35, %v212_v34  ;;  %v470_v39 = vpack.c.bf16 %v215_v38, %v214_v37  ;;  %v125_v50 = vld [vmem:[%s628_s1 + $0xb8] sm:$0x3]  ;;  %v328_v53 = vld [vmem:[%s628_s1 + $0xba] ss:$0 sm:$0xff]  ;;  %v329_v58 = vld [vmem:[%s628_s1 + $0xbb] ss:$0 sm:$0xff]  ;;  %p485_p3 = por %p484_p2, %p483_p1 }
   0xd   :  { %441 = vmatpush3.bf16.msra.mxu0 %v438_v9 }
   0xe   :  { %376 = vmatprep.subr.mxu0 %v22_v10  ;;  %453 = vmatpush3.bf16.msra.mxu1 %v452_v21  ;;  %p486_p4 = pnand %p485_p3, %p479_p0 }
   0xf   :  { %454 = vmatprep.subr.bf16.mxu1 %v502_v14 }
  0x11   :  { %377 = vmatpush3.msra.mxu0 %v22_v10 }
  0x12   :  { %379 = vmatmul.mubr.msk.f32.vlgmr.msra.gmra.mrb[0].mxu0 %vm23_vm0, %v13_v11  ;;  %442 = vmatprep.subr.bf16.mxu0 %v502_v14 }
  0x13   :  { %381 = vmatprep.mubr.msk.f32.mxu0 %vm23_vm0, %v14_v12  ;;  %456 = vmatpush3.bf16.msra.mxu1 %v455_v24 }
  0x14   :  { %457 = vmatprep.subr.bf16.mxu1 %v502_v14 }
  0x16   :  { %382 = vmatmul.mubr.msk.f32.gmra.mrb[2].mxu0 %vm23_vm0, %v15_v13 }
  0x17   :  { %392 = vmatprep.mubr.msk.f32.mxu0 %vm503_vm1, %v504_v15  ;;  %459 = vmatpush3.bf16.msra.mxu1 %v458_v27 }
  0x18   :  { %460 = vmatprep.subr.bf16.mxu1 %v502_v14 }
  0x1b   :  { %462 = vmatpush3.bf16.msra.mxu1 %v461_v30 }
  0x1c   :  { %463 = vmatprep.subr.bf16.mxu1 %v502_v14 }
  0x1f   :  { %465 = vmatpush3.bf16.msra.mxu1 %v464_v33 }
  0x20   :  { %466 = vmatprep.subr.bf16.mxu1 %v502_v14 }
  0x23   :  { %468 = vmatpush3.bf16.msra.mxu1 %v467_v36 }
  0x24   :  { %469 = vmatprep.subr.bf16.mxu1 %v502_v14 }
  0x27   :  { %471 = vmatpush3.bf16.msra.mxu1 %v470_v39 }
  0xe5   :  { %v380_v40 = vpop.f32.mrb[0].mxu0 }
  0xe6   :  { %v122_v41 = vmax.f32 %v380_v40, 0.0  ;;  %v102_v42 = vpop.f32.mrb[1].mxu0 }
  0xe7   :  { %v121_v43 = vmax.f32 %v102_v42, 0.0 }
  0xe9   :  { %v443_v44 = vpack.c.bf16 %v122_v41, %v121_v43  ;;  %v383_v45 = vpop.f32.mrb[2].mxu0 }
  0xea   :  { %v124_v46 = vmax.f32 %v383_v45, 0.0  ;;  %v112_v47 = vpop.f32.mrb[3].mxu0 }
  0xeb   :  { %v123_v48 = vmax.f32 %v112_v47, 0.0  ;;  %444 = vmatpush3.bf16.msra.mxu0 %v443_v44 }
  0xec   :  { %445 = vmatprep.subr.bf16.mxu0 %v502_v14 }
  0xed   :  { %v446_v49 = vpack.c.bf16 %v124_v46, %v123_v48 }
  0xef   :  { %447 = vmatpush3.bf16.msra.mxu0 %v446_v49 }
  0xf2   :  { %393 = vmatmul.mubr.msk.f32.vlgmr.msra.gmra.mrb[4].mxu0 %vm126_vm2, %v125_v50 }
 0x1c5   :  { %v196_v51 = vpop.f32.mrb[4].mxu0 }
 0x1c6   :  { %v394_v52 = vpop.f32.mrb[5].mxu0  ;;  %428 = vmatmul.mubr.f32.vlgmr.msra.gmra.mrb[0].mxu1 %v196_v51 }
 0x299   :  { %v287_v54 = vpop.f32.mrb[0].mxu1 }
 0x29a   :  { %v288_v55 = vadd.f32 %v328_v53, %v287_v54  ;;  %v429_v56 = vpop.f32.mrb[1].mxu1 }
 0x29c   :  { %v292_v57 = vmul.f32 %v288_v55, %v288_v55  ;;  %v304_v0 = vmul.f32 %v329_v58, %v288_v55 }
 0x29e   :  { %v297_v59 = vmul.f32 %v329_v58, %v292_v57 }
 0x2a0   :  { %v299_v60 = vsel %vm298_vm3, %v297_v59, 0.0 }
 0x2a1   :  { %300 = vadd.xlane.f32.xlu0 %v299_v60 }
 0x32e   :  { %v301_v61 = vpop.xlane.xlu0 %300 }
 0x32f   :  { %v302_v62 = vadd.f32 1e-12, %v301_v61 }
 0x331   :  { %476 = vrsqrt.f32 %v302_v62 }
 0x33b   :  { %v477_v63 = vpop.eup %476 }
 0x33c   :  { %v330_v1 = vadd.f32 -1.0, %v477_v63 }
 0x33e   :  { %v306_v2 = vmul.f32 %v330_v1, %v304_v0 }
 0x340   :  { %v307_v3 = vadd.f32 %v306_v2, %v288_v55 }
 0x342   :  { %308 = vst [vmem:[#allocation2] sm:$0x3] %v307_v3 }
 0x343   :  { %489 = shalt.err (!%p486_p4)
}
 0x344   :  { %s490_s15 = scalar_lea.hbm %s629_s2, 32 }
 0x345   :  { %p491_p5 = scmp.ne.s32.totalorder %s629_s2, %s490_s15  ;;  %p494_p6 = scmp.lt.u32.totalorder %s490_s15, %s629_s2 }
 0x347   :  { %p496_p7 = pnand %p494_p6, %p491_p5 }
 0x349   :  { %499 = shalt.err (!%p496_p7)
}
 0x34a   :  { %318 = dma.vmem_to_hbm [thread:$0]  %s316_s12, 32, %s629_s2, [#allocation3]  }
 0x34b   :  { %500 = dma.done.wait [#allocation3], 32  }
 0x34c   :  { %501 = vsyncadd [#allocation3], 4294967264 }
 0x34d   :  { %322 = vsyncpa [#allocation3], 1 }

</bundles_post_ra>
